<compile_context>
chip_gen: v6e
topology: v6e:2x2x1
jax: 0.10.0
libtpu: 0.0.40
codegen_flags: <defaults>
</compile_context>

<pallas_src>
import jax
import jax.numpy as jnp
from jax.experimental import pallas as pl
from jax.experimental.pallas import tpu as pltpu


# ----------------------------- kernel body ---------------------------------

def mlp_kernel(x_ref, w1_ref, b1_ref, w2_ref, b2_ref, w3_ref, b3_ref, o_ref):
    # hidden1 + ReLU  (bf16 operands, f32 accumulate, f32 epilogue)
    h1 = jnp.dot(x_ref[...], w1_ref[...], preferred_element_type=jnp.float32)
    h1 = jnp.maximum(h1 + b1_ref[...], 0.0)
    # hidden2 + ReLU
    h2 = jnp.dot(h1.astype(jnp.bfloat16), w2_ref[...],
                 preferred_element_type=jnp.float32)
    h2 = jnp.maximum(h2 + b2_ref[...], 0.0)
    # final linear (no activation)
    out = jnp.dot(h2.astype(jnp.bfloat16), w3_ref[...],
                  preferred_element_type=jnp.float32)
    o_ref[...] = (out + b3_ref[...]).astype(o_ref.dtype)


# ------------------------------ wrapper -------------------------------------

def _round_up(n, m):
    return ((n + m - 1) // m) * m


def _pad_to(a, shape):
    pads = [(0, t - s) for s, t in zip(a.shape, shape)]
    return jnp.pad(a, pads)


def mnist_mlp_forward(x, w1, b1, w2, b2, w3, b3, *, block_b=512):
    """Forward pass of MNISTNeuralNetwork.

    x : (B, 784) float
    w1: (100, 784), b1: (100,)   -- PyTorch nn.Linear layout (out, in)
    w2: (50, 100),  b2: (50,)
    w3: (10, 50),   b3: (10,)
    returns (B, 10) float32 logits.
    """
    B, d_in = x.shape
    assert d_in == 784
    H1 = H2 = H3 = 128  # lane-padded widths for 100 / 50 / 10

    # Batch tile: big for pipelining, but don't over-pad tiny batches.
    # Multiple of 16 for bf16 sublane packing.
    TB = block_b if B >= block_b else _round_up(B, 16)
    B_pad = pl.cdiv(B, TB) * TB

    # Pad + cast operands (bf16 matmul inputs, f32 biases).
    xp = _pad_to(x, (B_pad, d_in)).astype(jnp.bfloat16)
    w1p = _pad_to(w1.T, (d_in, H1)).astype(jnp.bfloat16)   # (784, 128)
    w2p = _pad_to(w2.T, (H1, H2)).astype(jnp.bfloat16)     # (128, 128)
    w3p = _pad_to(w3.T, (H2, H3)).astype(jnp.bfloat16)     # (128, 128)
    b1p = _pad_to(b1.reshape(1, -1), (1, H1)).astype(jnp.float32)
    b2p = _pad_to(b2.reshape(1, -1), (1, H2)).astype(jnp.float32)
    b3p = _pad_to(b3.reshape(1, -1), (1, H3)).astype(jnp.float32)

    grid = (B_pad // TB,)

    def resident(shape):  # weights/biases: same block every step -> stay in VMEM
        return pl.BlockSpec(shape, lambda i: (0,) * len(shape))

    out = pl.pallas_call(
        mlp_kernel,
        out_shape=jax.ShapeDtypeStruct((B_pad, H3), jnp.float32),
        grid=grid,
        in_specs=[
            pl.BlockSpec((TB, d_in), lambda i: (i, 0)),   # x: tiled over batch
            resident((d_in, H1)), resident((1, H1)),
            resident((H1, H2)), resident((1, H2)),
            resident((H2, H3)), resident((1, H3)),
        ],
        out_specs=pl.BlockSpec((TB, H3), lambda i: (i, 0)),
        compiler_params=pltpu.CompilerParams(
            dimension_semantics=("parallel",)),
    )(xp, w1p, b1p, w2p, b2p, w3p, b3p)

    return out[:B, :10]


# --------------------------- init & reference --------------------------------

def init_params(key):
    """Deterministic init mimicking nn.Linear: weight (out, in), bias (out,)."""
    ks = jax.random.split(key, 6)

    def linear(kw, kb, fan_in, fan_out):
        bound = 1.0 / (fan_in ** 0.5)
        w = jax.random.uniform(kw, (fan_out, fan_in), jnp.float32, -bound, bound)
        b = jax.random.uniform(kb, (fan_out,), jnp.float32, -bound, bound)
        return w, b

    w1, b1 = linear(ks[0], ks[1], 784, 100)
    w2, b2 = linear(ks[2], ks[3], 100, 50)
    w3, b3 = linear(ks[4], ks[5], 50, 10)
    return w1, b1, w2, b2, w3, b3


def reference_forward(x, w1, b1, w2, b2, w3, b3):
    """Plain-JAX reference with the same precision recipe as the kernel
    (bf16 matmul operands, f32 accumulation / epilogue)."""
    def lin(v, w, b):
        return jnp.dot(v.astype(jnp.bfloat16), w.T.astype(jnp.bfloat16),
                       preferred_element_type=jnp.float32) + b
    h1 = jnp.maximum(lin(x, w1, b1), 0.0)
    h2 = jnp.maximum(lin(h1, w2, b2), 0.0)
    return lin(h2, w3, b3)


# --------------------------------- main --------------------------------------

if __name__ == "__main__":
    key = jax.random.PRNGKey(0)
    k_x, k_x2, k_p = jax.random.split(key, 3)
    params = init_params(k_p)

    # Small demo batch.
    batch = 8
    x = jax.random.normal(k_x, (batch, 784), dtype=jnp.float32)
    out = jax.block_until_ready(mnist_mlp_forward(x, *params))
    ref = reference_forward(x, *params)
    assert out.shape == (batch, 10)
    assert jnp.allclose(out, ref, atol=1e-3, rtol=1e-3), "mismatch vs reference (B=8)"

    # Ragged batch exercising the multi-tile grid + batch padding path.
    batch2 = 300
    x2 = jax.random.normal(k_x2, (batch2, 784), dtype=jnp.float32)
    out2 = jax.block_until_ready(mnist_mlp_forward(x2, *params, block_b=128))
    ref2 = reference_forward(x2, *params)
    assert out2.shape == (batch2, 10)
    assert jnp.allclose(out2, ref2, atol=1e-3, rtol=1e-3), "mismatch vs reference (B=300)"

    print("KERNEL_OK")
</pallas_src>

<mosaic_0001>
module attributes {stable_mosaic.version = 11 : i64} {
  func.func @mlp_kernel(%arg0: i32, %arg1: memref<16x784xbf16, #tpu.memory_space<vmem>>, %arg2: memref<784x128xbf16, #tpu.memory_space<vmem>>, %arg3: memref<1x128xf32, #tpu.memory_space<vmem>>, %arg4: memref<128x128xbf16, #tpu.memory_space<vmem>>, %arg5: memref<1x128xf32, #tpu.memory_space<vmem>>, %arg6: memref<128x128xbf16, #tpu.memory_space<vmem>>, %arg7: memref<1x128xf32, #tpu.memory_space<vmem>>, %arg8: memref<16x128xf32, #tpu.memory_space<vmem>>) attributes {dimension_semantics = [#tpu.dimension_semantics<parallel>], iteration_bounds = array<i64: 1>, scalar_prefetch = 0 : i64, scratch_operands = 0 : i64, tpu.core_type = #tpu.core_type<tc>, window_params = [{transform_indices = @transform_0, window_bounds = array<i64: 16, 784>}, {pipeline_mode = #tpu.pipeline_mode<synchronous>, transform_indices = @transform_1, window_bounds = array<i64: 784, 128>}, {pipeline_mode = #tpu.pipeline_mode<synchronous>, transform_indices = @transform_2, window_bounds = array<i64: 1, 128>}, {pipeline_mode = #tpu.pipeline_mode<synchronous>, transform_indices = @transform_3, window_bounds = array<i64: 128, 128>}, {pipeline_mode = #tpu.pipeline_mode<synchronous>, transform_indices = @transform_4, window_bounds = array<i64: 1, 128>}, {pipeline_mode = #tpu.pipeline_mode<synchronous>, transform_indices = @transform_5, window_bounds = array<i64: 128, 128>}, {pipeline_mode = #tpu.pipeline_mode<synchronous>, transform_indices = @transform_6, window_bounds = array<i64: 1, 128>}, {transform_indices = @transform_7, window_bounds = array<i64: 16, 128>}]} {
    %c0 = arith.constant 0 : index
    %c0_0 = arith.constant 0 : index
    %0 = vector.load %arg1[%c0, %c0_0] : memref<16x784xbf16, #tpu.memory_space<vmem>>, vector<16x784xbf16>
    %c0_1 = arith.constant 0 : index
    %c0_2 = arith.constant 0 : index
    %1 = vector.load %arg2[%c0_1, %c0_2] : memref<784x128xbf16, #tpu.memory_space<vmem>>, vector<784x128xbf16>
    %cst = arith.constant dense<0.000000e+00> : vector<16x128xf32>
    %2 = tpu.matmul %0, %1, %cst {dimension_numbers = #tpu.dot_dimension_numbers<[1], [0], [0], [1], [0, 0, 1, 1], [], []>} : vector<16x784xbf16>, vector<784x128xbf16>, vector<16x128xf32> -> vector<16x128xf32>
    %c0_3 = arith.constant 0 : index
    %c0_4 = arith.constant 0 : index
    %3 = vector.load %arg3[%c0_3, %c0_4] : memref<1x128xf32, #tpu.memory_space<vmem>>, vector<1x128xf32>
    %4 = vector.broadcast %3 : vector<1x128xf32> to vector<16x128xf32>
    %5 = arith.addf %2, %4 : vector<16x128xf32>
    %cst_5 = arith.constant 0.000000e+00 : f32
    %6 = vector.broadcast %cst_5 : f32 to vector<16x128xf32>
    %7 = arith.maximumf %5, %6 : vector<16x128xf32>
    %8 = arith.truncf %7 : vector<16x128xf32> to vector<16x128xbf16>
    %c0_6 = arith.constant 0 : index
    %c0_7 = arith.constant 0 : index
    %9 = vector.load %arg4[%c0_6, %c0_7] : memref<128x128xbf16, #tpu.memory_space<vmem>>, vector<128x128xbf16>
    %cst_8 = arith.constant dense<0.000000e+00> : vector<16x128xf32>
    %10 = tpu.matmul %8, %9, %cst_8 {dimension_numbers = #tpu.dot_dimension_numbers<[1], [0], [0], [1], [0, 0, 1, 1], [], []>} : vector<16x128xbf16>, vector<128x128xbf16>, vector<16x128xf32> -> vector<16x128xf32>
    %c0_9 = arith.constant 0 : index
    %c0_10 = arith.constant 0 : index
    %11 = vector.load %arg5[%c0_9, %c0_10] : memref<1x128xf32, #tpu.memory_space<vmem>>, vector<1x128xf32>
    %12 = vector.broadcast %11 : vector<1x128xf32> to vector<16x128xf32>
    %13 = arith.addf %10, %12 : vector<16x128xf32>
    %cst_11 = arith.constant 0.000000e+00 : f32
    %14 = vector.broadcast %cst_11 : f32 to vector<16x128xf32>
    %15 = arith.maximumf %13, %14 : vector<16x128xf32>
    %16 = arith.truncf %15 : vector<16x128xf32> to vector<16x128xbf16>
    %c0_12 = arith.constant 0 : index
    %c0_13 = arith.constant 0 : index
    %17 = vector.load %arg6[%c0_12, %c0_13] : memref<128x128xbf16, #tpu.memory_space<vmem>>, vector<128x128xbf16>
    %cst_14 = arith.constant dense<0.000000e+00> : vector<16x128xf32>
    %18 = tpu.matmul %16, %17, %cst_14 {dimension_numbers = #tpu.dot_dimension_numbers<[1], [0], [0], [1], [0, 0, 1, 1], [], []>} : vector<16x128xbf16>, vector<128x128xbf16>, vector<16x128xf32> -> vector<16x128xf32>
    %c0_15 = arith.constant 0 : index
    %c0_16 = arith.constant 0 : index
    %19 = vector.load %arg7[%c0_15, %c0_16] : memref<1x128xf32, #tpu.memory_space<vmem>>, vector<1x128xf32>
    %20 = vector.broadcast %19 : vector<1x128xf32> to vector<16x128xf32>
    %21 = arith.addf %18, %20 : vector<16x128xf32>
    %c0_17 = arith.constant 0 : index
    %c0_18 = arith.constant 0 : index
    %22 = vector.load %arg8[%c0_17, %c0_18] : memref<16x128xf32, #tpu.memory_space<vmem>>, vector<16x128xf32>
    tpu.vector_store %arg8[%c0_17, %c0_18], %21 {strides = array<i32>} : memref<16x128xf32, #tpu.memory_space<vmem>>, vector<16x128xf32>,
    return
  }
  func.func @transform_0(%arg0: i32) -> (i32, i32) {
    %c0_i32 = arith.constant 0 : i32
    %c0_i32_0 = arith.constant 0 : i32
    return %arg0, %c0_i32 : i32, i32
  }
  func.func @transform_1(%arg0: i32) -> (i32, i32) {
    %c0_i32 = arith.constant 0 : i32
    %c0_i32_0 = arith.constant 0 : i32
    %c0_i32_1 = arith.constant 0 : i32
    return %c0_i32, %c0_i32_0 : i32, i32
  }
  func.func @transform_2(%arg0: i32) -> (i32, i32) {
    %c0_i32 = arith.constant 0 : i32
    %c0_i32_0 = arith.constant 0 : i32
    %c0_i32_1 = arith.constant 0 : i32
    return %c0_i32, %c0_i32_0 : i32, i32
  }
  func.func @transform_3(%arg0: i32) -> (i32, i32) {
    %c0_i32 = arith.constant 0 : i32
    %c0_i32_0 = arith.constant 0 : i32
    %c0_i32_1 = arith.constant 0 : i32
    return %c0_i32, %c0_i32_0 : i32, i32
  }
  func.func @transform_4(%arg0: i32) -> (i32, i32) {
    %c0_i32 = arith.constant 0 : i32
    %c0_i32_0 = arith.constant 0 : i32
    %c0_i32_1 = arith.constant 0 : i32
    return %c0_i32, %c0_i32_0 : i32, i32
  }
  func.func @transform_5(%arg0: i32) -> (i32, i32) {
    %c0_i32 = arith.constant 0 : i32
    %c0_i32_0 = arith.constant 0 : i32
    %c0_i32_1 = arith.constant 0 : i32
    return %c0_i32, %c0_i32_0 : i32, i32
  }
  func.func @transform_6(%arg0: i32) -> (i32, i32) {
    %c0_i32 = arith.constant 0 : i32
    %c0_i32_0 = arith.constant 0 : i32
    %c0_i32_1 = arith.constant 0 : i32
    return %c0_i32, %c0_i32_0 : i32, i32
  }
  func.func @transform_7(%arg0: i32) -> (i32, i32) {
    %c0_i32 = arith.constant 0 : i32
    %c0_i32_0 = arith.constant 0 : i32
    return %arg0, %c0_i32 : i32, i32
  }
}

</mosaic_0001>

<bundles_post_ra>
// kernel: tpu_custom_call.1
= control target key start
LH: loop header
LB: loop body
LE: loop exit
PB: predicated region body
PF: predicated region fallthrough
CT: control target
= control target key end

     0   :  { %12 = vsyncpa [#allocation3], 0  ;;  %s1457_s0 = inlined_call_operand.hbm [shape: bf16[16,784], index: 0, kind: input, shape index: {}]   ;;  %s1458_s1 = inlined_call_operand.hbm [shape: bf16[784,128], index: 1, kind: input, shape index: {}]   ;;  %s1459_s2 = inlined_call_operand.vmem [shape: f32[1,128], index: 2, kind: input, shape index: {}]   ;;  %s1460_s3 = inlined_call_operand.hbm [shape: bf16[128,128], index: 3, kind: input, shape index: {}]   ;;  %s1461_s4 = inlined_call_operand.vmem [shape: f32[1,128], index: 4, kind: input, shape index: {}]   ;;  %s1462_s5 = inlined_call_operand.hbm [shape: bf16[128,128], index: 5, kind: input, shape index: {}]   ;;  %s1463_s6 = inlined_call_operand.vmem [shape: f32[1,128], index: 6, kind: input, shape index: {}]   ;;  %s1464_s7 = inlined_call_operand.hbm [shape: f32[16,128], index: 7, kind: output, shape index: {}]  }
   0x1   :  { %13 = vsyncpa [#allocation6], 0 }
   0x2   :  { %14 = vsyncpa [#allocation9], 0 }
   0x3   :  { %15 = vsyncpa [#allocation4], 0  ;;  %s1348_s24 = smov [#allocation5]  }
   0x4   :  { %s33_s25 = sshll.u32 %s1348_s24, 4  ;;  %s34_s25 = int_to_ptr.vmem [resolvable:$true] %s33_s25 }
   0x5   :  { %s1248_s26 = scalar_lea.vmem %s34_s25, 6272  ;;  %p1253_p1 = scmp.lt.s32.totalorder %s34_s25, %s34_s25 }
   0x6   :  { %p1249_p0 = scmp.ne.s32.totalorder %s34_s25, %s1248_s26  ;;  %p1254_p2 = scmp.lt.s32.totalorder %s1248_s26, %s1248_s26 }
   0x8   :  { %p1255_p3 = por %p1254_p2, %p1253_p1 }
   0xa   :  { %p1256_p4 = pnand %p1255_p3, %p1249_p0 }
   0xc   :  { %1259 = shalt.err (!%p1256_p4)
}
   0xd   :  { %s1349_s27 = smov 64   ;;  %s1350_s28 = smov 4  }
   0xe   :  { %39 = dma.hbm_to_vmem [thread:$0]  %s1458_s1, 6272, %s34_s25, [#allocation6], %s1349_s27, %s1349_s27, %s1350_s28  }
   0xf   :  { %s1351_s8 = smov [#allocation2]  }
  0x10   :  { %s21_s9 = sshll.u32 %s1351_s8, 4  ;;  %s22_s9 = int_to_ptr.vmem [resolvable:$true] %s21_s9 }
  0x11   :  { %s1268_s10 = scalar_lea.vmem %s22_s9, 896  ;;  %p1273_p6 = scmp.lt.s32.totalorder %s22_s9, %s22_s9 }
  0x12   :  { %p1269_p5 = scmp.ne.s32.totalorder %s22_s9, %s1268_s10  ;;  %p1274_p7 = scmp.lt.s32.totalorder %s1268_s10, %s1268_s10 }
  0x14   :  { %p1275_p8 = por %p1274_p7, %p1273_p6 }
  0x16   :  { %p1276_p9 = pnand %p1275_p8, %p1269_p5 }
  0x18   :  { %1279 = shalt.err (!%p1276_p9)
}
  0x19   :  { %s1352_s11 = smov 448   ;;  %s1353_s12 = smov 28  }
  0x1a   :  { %27 = dma.hbm_to_vmem [thread:$0]  %s1457_s0, 896, %s22_s9, [#allocation3], %s1352_s11, %s1352_s11, %s1353_s12  }
  0x1b   :  { %s1354_s15 = smov [#allocation7]   ;;  %s1355_s17 = smov [#allocation8]  }
  0x1c   :  { %s47_s16 = sshll.u32 %s1354_s15, 4  ;;  %s61_s1 = sshll.u32 %s1355_s17, 4  ;;  %s48_s16 = int_to_ptr.vmem [resolvable:$true] %s47_s16  ;;  %s62_s1 = int_to_ptr.vmem [resolvable:$true] %s61_s1 }
  0x1d   :  { %s1288_s18 = scalar_lea.vmem %s48_s16, 1024  ;;  %p1293_p11 = scmp.lt.s32.totalorder %s48_s16, %s48_s16 }
  0x1e   :  { %p1289_p10 = scmp.ne.s32.totalorder %s48_s16, %s1288_s18  ;;  %p1294_p12 = scmp.lt.s32.totalorder %s1288_s18, %s1288_s18 }
  0x20   :  { %p1295_p13 = por %p1294_p12, %p1293_p11 }
  0x22   :  { %p1296_p0 = pnand %p1295_p13, %p1289_p10 }
  0x24   :  { %1299 = shalt.err (!%p1296_p0)
}
  0x25   :  { %53 = dma.hbm_to_vmem [thread:$0]  %s1460_s3, 1024, %s48_s16, [#allocation6], %s1349_s27, %s1349_s27, %s1350_s28  }
  0x26   :  { %s1308_s0 = scalar_lea.vmem %s62_s1, 1024  ;;  %p1313_p2 = scmp.lt.s32.totalorder %s62_s1, %s62_s1 }
  0x27   :  { %p1309_p1 = scmp.ne.s32.totalorder %s62_s1, %s1308_s0  ;;  %p1314_p3 = scmp.lt.s32.totalorder %s1308_s0, %s1308_s0 }
  0x29   :  { %p1315_p4 = por %p1314_p3, %p1313_p2 }
  0x2b   :  { %p1316_p5 = pnand %p1315_p4, %p1309_p1 }
  0x2d   :  { %1319 = shalt.err (!%p1316_p5)
}
  0x2e   :  { %67 = dma.hbm_to_vmem [thread:$0]  %s1462_s5, 1024, %s62_s1, [#allocation9], %s1349_s27, %s1349_s27, %s1350_s28  }
  0x2f   :  { %1340 = dma.done.wait [#allocation3], 896  }
  0x30   :  { %1341 = vsyncadd [#allocation3], 4294966400 }
  0x31   :  { %1342 = dma.done.wait [#allocation6], 7296  }
  0x32   :  { %1343 = vsyncadd [#allocation6], 4294960000 }
  0x33   :  { %1344 = dma.done.wait [#allocation9], 1024  }
  0x34   :  { %1345 = vsyncadd [#allocation9], 4294966272  ;;  %v1165_v0 = vld [vmem:[#allocation5 + $0x78] sm:$0xff]   ;;  %v1169_v4 = vld [vmem:[#allocation5 + $0x70] sm:$0xff]   ;;  %v1356_v38 = vmov 0.0   ;;  %vm1357_vm0 = vmmov 0  }
  0x35   :  { %v1166_v1 = vld [vmem:[#allocation5 + $0x38] sm:$0xff]   ;;  %1020 = vmatprep.subr.bf16.mxu0 %v1165_v0  ;;  %v1170_v5 = vld [vmem:[#allocation5 + $0x30] sm:$0xff]   ;;  %v1173_v8 = vld [vmem:[#allocation5 + $0x68] sm:$0xff]   ;;  %vm525_vm1 = vcmask 130048   ;;  %s1358_s26 = smov [#allocation10]  }
  0x36   :  { %v1167_v2 = vld [vmem:[#allocation5 + $0xf8] sm:$0xff]   ;;  %1021 = vmatpush3.bf16.msra.mxu0 %v1166_v1  ;;  %v1171_v6 = vld [vmem:[#allocation5 + $0xf0] sm:$0xff]   ;;  %v1174_v9 = vld [vmem:[#allocation5 + $0x28] sm:$0xff]   ;;  %s930_s27 = sshll.u32 %s1358_s26, 4  ;;  %s931_s27 = int_to_ptr.vmem [resolvable:$true] %s930_s27 }
  0x37   :  { %v1168_v3 = vld [vmem:[#allocation5 + $0xb8] sm:$0xff]   ;;  %1042 = vmatprep.subr.bf16.mxu1 %v1167_v2  ;;  %1022 = vmatprep.subr.bf16.mxu0 %v1169_v4  ;;  %v1172_v7 = vld [vmem:[#allocation5 + $0xb0] sm:$0xff]   ;;  %v1175_v10 = vld [vmem:[#allocation5 + $0xe8] sm:$0xff]   ;;  %p1325_p7 = scmp.lt.s32.totalorder %s931_s27, %s931_s27 }
  0x38   :  { %1043 = vmatpush3.bf16.msra.mxu1 %v1168_v3  ;;  %v1176_v11 = vld [vmem:[#allocation5 + $0xa8] sm:$0xff]   ;;  %v1177_v12 = vld [vmem:[#allocation5 + $0x60] sm:$0xff]   ;;  %v1181_v16 = vld [vmem:[#allocation5 + $0x58] sm:$0xff]  }
  0x39   :  { %1044 = vmatprep.subr.bf16.mxu1 %v1171_v6  ;;  %v1178_v13 = vld [vmem:[#allocation5 + $0x20] sm:$0xff]   ;;  %v1182_v17 = vld [vmem:[#allocation5 + $0x18] sm:$0xff]   ;;  %v1185_v20 = vld [vmem:[#allocation5 + $0x50] sm:$0xff]  }
  0x3a   :  { %1023 = vmatpush3.bf16.msra.mxu0 %v1170_v5  ;;  %v1179_v14 = vld [vmem:[#allocation5 + $0xe0] sm:$0xff]   ;;  %v1183_v18 = vld [vmem:[#allocation5 + $0xd8] sm:$0xff]   ;;  %v1186_v21 = vld [vmem:[#allocation5 + $0x10] sm:$0xff]  }
  0x3b   :  { %1024 = vmatprep.subr.bf16.mxu0 %v1173_v8  ;;  %v1180_v15 = vld [vmem:[#allocation5 + $0xa0] sm:$0xff]   ;;  %v1184_v19 = vld [vmem:[#allocation5 + $0x98] sm:$0xff]   ;;  %v1187_v22 = vld [vmem:[#allocation5 + $0xd0] sm:$0xff]  }
  0x3c   :  { %1045 = vmatpush3.bf16.msra.mxu1 %v1172_v7  ;;  %v1188_v23 = vld [vmem:[#allocation5 + $0x90] sm:$0xff]   ;;  %v1189_v24 = vld [vmem:[#allocation5 + $0x48] sm:$0xff]   ;;  %v1193_v28 = vld [vmem:[#allocation5 + $0x40] sm:$0xff]  }
  0x3d   :  { %1046 = vmatprep.subr.bf16.mxu1 %v1175_v10  ;;  %v1190_v25 = vld [vmem:[#allocation5 + $0x8] sm:$0xff]   ;;  %v1194_v29 = vld [vmem:[#allocation5] sm:$0xff]   ;;  %v1200_v34 = vld [vmem:[#allocation5 + $0x178] sm:$0xff]  }
  0x3e   :  { %1025 = vmatpush3.bf16.msra.mxu0 %v1174_v9  ;;  %v1191_v26 = vld [vmem:[#allocation5 + $0xc8] sm:$0xff]   ;;  %v1195_v30 = vld [vmem:[#allocation5 + $0xc0] sm:$0xff]   ;;  %v1203_v36 = vld [vmem:[#allocation2 + $0xc] ss:$28 sps:$4 sm:$0xff]  }
  0x3f   :  { %1026 = vmatprep.subr.bf16.mxu0 %v1177_v12  ;;  %v1192_v27 = vld [vmem:[#allocation5 + $0x88] sm:$0xff]   ;;  %v1199_v33 = vld [vmem:[#allocation5 + $0x80] sm:$0xff]   ;;  %v1204_v37 = vld [vmem:[#allocation5 + $0x138] sm:$0xff]   ;;  %602 = vmatprep.mubr.bf16.mxu1 %v1203_v36 }
  0x40   :  { %1047 = vmatpush3.bf16.msra.mxu1 %v1176_v11  ;;  %v1196_v31 = vld [vmem:[#allocation2] ss:$28 sps:$4 sm:$0xff]   ;;  %v1201_v35 = vld [vmem:[#allocation2 + $0x8] ss:$28 sps:$4 sm:$0xff]   ;;  %v1211_v45 = vld [vmem:[#allocation5 + $0x158] sm:$0xff]  }
  0x41   :  { %1048 = vmatprep.subr.bf16.mxu1 %v1179_v14  ;;  %v1198_v32 = vld [vmem:[#allocation2 + $0x4] ss:$28 sps:$4 sm:$0xff]   ;;  %v1205_v39 = vld [vmem:[#allocation5 + $0x170] sm:$0xff]   ;;  %v1209_v43 = vld [vmem:[#allocation5 + $0x160] sm:$0xff]  }
  0x42   :  { %1027 = vmatpush3.bf16.msra.mxu0 %v1178_v13  ;;  %561 = vmatprep.mubr.bf16.mxu0 %v1198_v32  ;;  %v1206_v40 = vld [vmem:[#allocation5 + $0x130] sm:$0xff]   ;;  %v1207_v41 = vld [vmem:[#allocation5 + $0x168] sm:$0xff]   ;;  %v1210_v44 = vld [vmem:[#allocation5 + $0x120] sm:$0xff]  }
  0x43   :  { %1028 = vmatprep.subr.bf16.mxu0 %v1181_v16  ;;  %v1208_v42 = vld [vmem:[#allocation5 + $0x128] sm:$0xff]   ;;  %v1212_v46 = vld [vmem:[#allocation5 + $0x118] sm:$0xff]   ;;  %v1213_v47 = vld [vmem:[#allocation5 + $0x150] sm:$0xff]  }
  0x44   :  { %1049 = vmatpush3.bf16.msra.mxu1 %v1180_v15  ;;  %v1219_v48 = vld [vmem:[#allocation5 + $0x180] sm:$0xff]   ;;  %v1214_v49 = vld [vmem:[#allocation5 + $0x110] sm:$0xff]   ;;  %v1222_v50 = vld [vmem:[#allocation2 + $0x14] ss:$28 sps:$4 sm:$0xff]  }
  0x45   :  { %1050 = vmatprep.subr.bf16.mxu1 %v1183_v18  ;;  %v1215_v51 = vld [vmem:[#allocation5 + $0x148] sm:$0xff]   ;;  %v1223_v52 = vld [vmem:[#allocation2 + $0x18] ss:$28 sps:$4 sm:$0xff]   ;;  %v1220_v56 = vld [vmem:[#allocation2 + $0x10] ss:$28 sps:$4 sm:$0xff]  }
  0x46   :  { %1029 = vmatpush3.bf16.msra.mxu0 %v1182_v17  ;;  %v1216_v53 = vld [vmem:[#allocation5 + $0x108] sm:$0xff]   ;;  %v1217_v54 = vld [vmem:[#allocation5 + $0x140] sm:$0xff]   ;;  %v1225_v58 = vld [vmem:[#allocation7 + $0x30] sm:$0xff]  }
  0x47   :  { %1030 = vmatprep.subr.bf16.mxu0 %v1185_v20  ;;  %v1218_v55 = vld [vmem:[#allocation5 + $0x100] sm:$0xff]   ;;  %v1226_v59 = vld [vmem:[#allocation7 + $0x28] sm:$0xff]   ;;  %v1227_v60 = vld [vmem:[#allocation7 + $0x20] sm:$0xff]  }
  0x48   :  { %1051 = vmatpush3.bf16.msra.mxu1 %v1184_v19  ;;  %v1224_v57 = vld [vmem:[#allocation7 + $0x38] sm:$0xff]   ;;  %v1229_v62 = vld [vmem:[#allocation7 + $0x10] sm:$0xff]   ;;  %v1230_v63 = vld [vmem:[#allocation7 + $0x8] sm:$0xff]  }
  0x49   :  { %1052 = vmatprep.subr.bf16.mxu1 %v1187_v22  ;;  %v1228_v61 = vld [vmem:[#allocation7 + $0x18] sm:$0xff]   ;;  %v1231_v0 = vld [vmem:[#allocation7] sm:$0xff]   ;;  %v1233_v2 = vld [vmem:[#allocation8 + $0x30] sm:$0xff]  }
  0x4a   :  { %1031 = vmatpush3.bf16.msra.mxu0 %v1186_v21  ;;  %v1232_v1 = vld [vmem:[#allocation8 + $0x38] sm:$0xff]   ;;  %v1234_v3 = vld [vmem:[#allocation8 + $0x28] sm:$0xff]   ;;  %v1235_v4 = vld [vmem:[#allocation8 + $0x20] sm:$0xff]  }
  0x4b   :  { %1032 = vmatprep.subr.bf16.mxu0 %v1189_v24  ;;  %v1236_v5 = vld [vmem:[#allocation8 + $0x18] sm:$0xff]   ;;  %v944_v18 = vld [vmem:[%s1459_s2] ss:$0 sm:$0xff] }
  0x4c   :  { %1053 = vmatpush3.bf16.msra.mxu1 %v1188_v23 }
  0x4d   :  { %1054 = vmatprep.subr.bf16.mxu1 %v1191_v26 }
  0x4e   :  { %1033 = vmatpush3.bf16.msra.mxu0 %v1190_v25 }
  0x4f   :  { %1034 = vmatprep.subr.bf16.mxu0 %v1193_v28 }
  0x50   :  { %1055 = vmatpush3.bf16.msra.mxu1 %v1192_v27 }
  0x51   :  { %1056 = vmatprep.subr.bf16.mxu1 %v1195_v30 }
  0x52   :  { %1035 = vmatpush3.bf16.msra.mxu0 %v1194_v29 }
  0x53   :  { %1064 = vmatprep.subr.bf16.mxu0 %v1200_v34 }
  0x54   :  { %1057 = vmatpush3.bf16.msra.mxu1 %v1199_v33 }
  0x55   :  { %562 = vmatmul.mubr.bf16.vlgmr.msra.gmra.mxu0 %v1196_v31  ;;  %1106 = vmatprep.subr.bf16.mxu1 %v1356_v38 }
  0x56   :  { %1065 = vmatpush3.bf16.msra.mxu0 %v1204_v37  ;;  %643 = vmatprep.mubr.bf16.mxu0 %v1222_v50 }
  0x57   :  { %603 = vmatmul.mubr.bf16.vlgmr.msra.gmra.mxu1 %v1201_v35  ;;  %1066 = vmatprep.subr.bf16.mxu0 %v1205_v39 }
  0x58   :  { %1108 = vmatprep.mubr.msk.bf16.mxu1 %vm1357_vm0, %v1356_v38  ;;  %1107 = vmatpush3.bf16.msra.mxu1 %v1219_v48 }
  0x59   :  { %1112 = vmatprep.subr.bf16.mxu1 %v1356_v38 }
  0x5a   :  { %1067 = vmatpush3.bf16.msra.mxu0 %v1206_v40 }
  0x5b   :  { %1068 = vmatprep.subr.bf16.mxu0 %v1207_v41  ;;  %v1237_v41 = vld [vmem:[#allocation8 + $0x10] sm:$0xff]  }
  0x5e   :  { %1069 = vmatpush3.bf16.msra.mxu0 %v1208_v42  ;;  %v1238_v42 = vld [vmem:[#allocation8 + $0x8] sm:$0xff]  }
  0x5f   :  { %1070 = vmatprep.subr.bf16.mxu0 %v1209_v43  ;;  %1109 = vmatmul.mubr.msk.bf16.vlgmr.msra.gmra.mxu1 %vm525_vm1, %v1223_v52  ;;  %v1239_v43 = vld [vmem:[#allocation8] sm:$0xff]  }
  0x60   :  { %1128 = vmatprep.mubr.msk.bf16.mxu1 %vm1357_vm0, %v1356_v38  ;;  %1113 = vmatpush3.bf16.msra.mxu1 %v1224_v57 }
  0x61   :  { %1114 = vmatprep.subr.bf16.mxu1 %v1356_v38 }
  0x62   :  { %1071 = vmatpush3.bf16.msra.mxu0 %v1210_v44  ;;  %v1002_v44 = vld [vmem:[%s1461_s4] ss:$0 sm:$0xff]  ;;  %s1320_s4 = scalar_lea.vmem %s931_s27, 256 }
  0x63   :  { %1072 = vmatprep.subr.bf16.mxu0 %v1211_v45  ;;  %p1321_p6 = scmp.ne.s32.totalorder %s931_s27, %s1320_s4  ;;  %p1326_p8 = scmp.lt.s32.totalorder %s1320_s4, %s1320_s4 }
  0x64   :  { %1115 = vmatpush3.bf16.msra.mxu1 %v1225_v58 }
  0x65   :  { %1116 = vmatprep.subr.bf16.mxu1 %v1356_v38  ;;  %p1327_p9 = por %p1326_p8, %p1325_p7 }
  0x66   :  { %1073 = vmatpush3.bf16.msra.mxu0 %v1212_v46 }
  0x67   :  { %1074 = vmatprep.subr.bf16.mxu0 %v1213_v47  ;;  %p1328_p10 = pnand %p1327_p9, %p1321_p6 }
  0x68   :  { %1117 = vmatpush3.bf16.msra.mxu1 %v1226_v59 }
  0x69   :  { %1118 = vmatprep.subr.bf16.mxu1 %v1356_v38 }
  0x6a   :  { %1075 = vmatpush3.bf16.msra.mxu0 %v1214_v49 }
  0x6b   :  { %1076 = vmatprep.subr.bf16.mxu0 %v1215_v51 }
  0x6c   :  { %1119 = vmatpush3.bf16.msra.mxu1 %v1227_v60 }
  0x6d   :  { %1120 = vmatprep.subr.bf16.mxu1 %v1356_v38 }
  0x6e   :  { %1077 = vmatpush3.bf16.msra.mxu0 %v1216_v53 }
  0x6f   :  { %1078 = vmatprep.subr.bf16.mxu0 %v1217_v54 }
  0x70   :  { %1121 = vmatpush3.bf16.msra.mxu1 %v1228_v61 }
  0x71   :  { %1122 = vmatprep.subr.bf16.mxu1 %v1356_v38 }
  0x72   :  { %1079 = vmatpush3.bf16.msra.mxu0 %v1218_v55 }
  0x73   :  { %1132 = vmatprep.subr.bf16.mxu0 %v1356_v38 }
  0x74   :  { %1123 = vmatpush3.bf16.msra.mxu1 %v1229_v62 }
  0x75   :  { %644 = vmatmul.mubr.bf16.vlgmr.msra.gmra.mxu0 %v1220_v56  ;;  %1124 = vmatprep.subr.bf16.mxu1 %v1356_v38 }
  0x76   :  { %1148 = vmatprep.mubr.msk.bf16.mxu0 %vm1357_vm0, %v1356_v38  ;;  %1133 = vmatpush3.bf16.msra.mxu0 %v1232_v1 }
  0x77   :  { %1134 = vmatprep.subr.bf16.mxu0 %v1356_v38 }
  0x78   :  { %1125 = vmatpush3.bf16.msra.mxu1 %v1230_v63 }
  0x79   :  { %1126 = vmatprep.subr.bf16.mxu1 %v1356_v38 }
  0x7a   :  { %1135 = vmatpush3.bf16.msra.mxu0 %v1233_v2 }
  0x7b   :  { %1136 = vmatprep.subr.bf16.mxu0 %v1356_v38 }
  0x7c   :  { %1127 = vmatpush3.bf16.msra.mxu1 %v1231_v0 }
  0x7e   :  { %1137 = vmatpush3.bf16.msra.mxu0 %v1234_v3 }
  0x7f   :  { %1138 = vmatprep.subr.bf16.mxu0 %v1356_v38 }
  0x82   :  { %1139 = vmatpush3.bf16.msra.mxu0 %v1235_v4 }
  0x83   :  { %1140 = vmatprep.subr.bf16.mxu0 %v1356_v38 }
  0x86   :  { %1141 = vmatpush3.bf16.msra.mxu0 %v1236_v5 }
  0x87   :  { %1142 = vmatprep.subr.bf16.mxu0 %v1356_v38 }
  0x8a   :  { %1143 = vmatpush3.bf16.msra.mxu0 %v1237_v41 }
  0x8b   :  { %1144 = vmatprep.subr.bf16.mxu0 %v1356_v38 }
  0x8e   :  { %1145 = vmatpush3.bf16.msra.mxu0 %v1238_v42 }
  0x8f   :  { %1146 = vmatprep.subr.bf16.mxu0 %v1356_v38  ;;  %v1011_v38 = vld [vmem:[%s1463_s6] ss:$0 sm:$0xff] }
  0x92   :  { %1147 = vmatpush3.bf16.msra.mxu0 %v1239_v43 }
 0x115   :  { %v1036_v9 = vpop.f32.mrf.mxu0 }
 0x117   :  { %v1058_v6 = vpop.f32.mrf.mxu1  ;;  %v1037_v12 = vpop.f32.mrf.mxu0 }
 0x118   :  { %v1038_v17 = vadd.f32 %v1037_v12, %v1036_v9 }
 0x119   :  { %v1059_v7 = vpop.f32.mrf.mxu1  ;;  %v1039_v15 = vpop.f32.mrf.mxu0 }
 0x11a   :  { %v564_v20 = vadd.f32 %v1038_v17, %v944_v18  ;;  %v1060_v21 = vadd.f32 %v1059_v7, %v1058_v6 }
 0x11b   :  { %v1061_v8 = vpop.f32.mrf.mxu1  ;;  %v1040_v19 = vpop.f32.mrf.mxu0 }
 0x11c   :  { %v1041_v22 = vadd.f32 %v1040_v19, %v1039_v15  ;;  %v605_v25 = vadd.f32 %v1060_v21, %v564_v20 }
 0x11d   :  { %v1062_v10 = vpop.f32.mrf.mxu1 }
 0x11e   :  { %v567_v26 = vadd.f32 %v1041_v22, %v944_v18  ;;  %v1063_v27 = vadd.f32 %v1062_v10, %v1061_v8 }
 0x11f   :  { %v686_v11 = vpop.f32.mrf.mxu1 }
 0x120   :  { %v608_v32 = vadd.f32 %v1063_v27, %v567_v26 }
 0x121   :  { %v1110_v13 = vpop.f32.mrf.mxu1 }
 0x123   :  { %v689_v14 = vpop.f32.mrf.mxu1 }
 0x125   :  { %v1111_v16 = vpop.f32.mrf.mxu1 }
 0x135   :  { %v1080_v23 = vpop.f32.mrf.mxu0 }
 0x137   :  { %v1081_v24 = vpop.f32.mrf.mxu0 }
 0x138   :  { %v1082_v28 = vadd.f32 %v1081_v24, %v1080_v23 }
 0x139   :  { %v1083_v29 = vpop.f32.mrf.mxu0 }
 0x13a   :  { %v646_v30 = vadd.f32 %v1082_v28, %v605_v25 }
 0x13b   :  { %v1084_v31 = vpop.f32.mrf.mxu0 }
 0x13c   :  { %v1085_v33 = vadd.f32 %v1084_v31, %v1083_v29  ;;  %v687_v34 = vadd.f32 %v686_v11, %v646_v30 }
 0x13e   :  { %v649_v35 = vadd.f32 %v1085_v33, %v608_v32  ;;  %v693_v37 = vmax.f32 %v687_v34, 0.0 }
 0x140   :  { %v690_v36 = vadd.f32 %v689_v14, %v649_v35 }
 0x142   :  { %v694_v39 = vmax.f32 %v690_v36, 0.0 }
 0x144   :  { %v695_v40 = vpack.c.bf16 %v694_v39, %v693_v37 }
 0x146   :  { %1129 = vmatmul.mubr.bf16.vlgmr.msra.gmra.mxu1 %v695_v40 }
 0x206   :  { %v801_v45 = vpop.f32.mrf.mxu1 }
 0x207   :  { %v802_v47 = vadd.f32 %v1002_v44, %v801_v45 }
 0x208   :  { %v1130_v46 = vpop.f32.mrf.mxu1 }
 0x209   :  { %v808_v51 = vmax.f32 %v802_v47, 0.0 }
 0x20a   :  { %v804_v48 = vpop.f32.mrf.mxu1 }
 0x20b   :  { %v805_v49 = vadd.f32 %v1002_v44, %v804_v48 }
 0x20c   :  { %v1131_v50 = vpop.f32.mrf.mxu1 }
 0x20d   :  { %v809_v52 = vmax.f32 %v805_v49, 0.0 }
 0x20f   :  { %v810_v53 = vpack.c.bf16 %v809_v52, %v808_v51 }
 0x211   :  { %1149 = vmatmul.mubr.bf16.vlgmr.msra.gmra.mxu0 %v810_v53 }
 0x2d1   :  { %v916_v54 = vpop.f32.mrf.mxu0 }
 0x2d2   :  { %v917_v55 = vadd.f32 %v1011_v38, %v916_v54 }
 0x2d3   :  { %v1150_v56 = vpop.f32.mrf.mxu0 }
 0x2d4   :  { %923 = vst [vmem:[#allocation10] sm:$0xff] %v917_v55 }
 0x2d5   :  { %v919_v57 = vpop.f32.mrf.mxu0 }
 0x2d6   :  { %v920_v58 = vadd.f32 %v1011_v38, %v919_v57 }
 0x2d7   :  { %v1151_v59 = vpop.f32.mrf.mxu0 }
 0x2d8   :  { %924 = vst [vmem:[#allocation10 + $0x8] sm:$0xff] %v920_v58 }
 0x2d9   :  { %1331 = shalt.err (!%p1328_p10)
}
 0x2da   :  { %s1359_s28 = smov 128   ;;  %s1360_s6 = smov 8  }
 0x2db   :  { %936 = dma.vmem_to_hbm [thread:$0]  %s931_s27, 256, %s1464_s7, [#allocation4], %s1359_s28, %s1359_s28, %s1360_s6  }
 0x2dc   :  { %1346 = dma.done.wait [#allocation4], 256  }
 0x2dd   :  { %1347 = vsyncadd [#allocation4], 4294967040 }
 0x2de   :  { %940 = vsyncpa [#allocation3], 1 }
 0x2df   :  { %941 = vsyncpa [#allocation6], 1 }
 0x2e0   :  { %942 = vsyncpa [#allocation9], 1 }
 0x2e1   :  { %943 = vsyncpa [#allocation4], 1 }

</bundles_post_ra>
